<compile_context>
chip_gen: v5e
topology: v5e:2x2
jax: 0.10.0
libtpu: 0.0.40
codegen_flags: <defaults>
</compile_context>

<pallas_src>
import functools

import jax
import jax.numpy as jnp
from jax.experimental import pallas as pl
from jax.experimental.pallas import tpu as pltpu


# ----------------------------- Pallas kernel ------------------------------- #
def mlp_kernel(x_ref, w1_ref, b1_ref, w2_ref, b2_ref, o_ref, *, bf16_epilogue):
    x = x_ref[...]                                        # [tm, IN]  bf16
    w1 = w1_ref[...]                                      # [IN, H]   bf16
    w2 = w2_ref[...]                                      # [H, OUT]  bf16

    # First matmul on the MXU with f32 accumulation.
    h = jnp.dot(x, w1, preferred_element_type=jnp.float32)   # [tm, H] f32

    if bf16_epilogue:
        # v6e/v7x: bf16 VALUs -> do bias + relu in bf16 (half the VPU ops and
        # half the vreg footprint of the hidden activation).
        h = jnp.maximum(h.astype(jnp.bfloat16) + b1_ref[...].astype(jnp.bfloat16), 0.0)
    else:
        # v5e (no bf16 VPU): keep bias + relu in f32, then repack to bf16.
        h = jnp.maximum(h + b1_ref[...], 0.0).astype(jnp.bfloat16)

    # Second matmul on the MXU, f32 accumulation; bias in f32; bf16 store.
    y = jnp.dot(h, w2, preferred_element_type=jnp.float32) + b2_ref[...]
    o_ref[...] = y.astype(o_ref.dtype)                    # lane-dense bf16 store


def _choose_tm(B, max_tm=1024):
    """Largest sublane-aligned divisor of B <= max_tm that keeps grid >= 2.

    Keeping grid length >= 2 lets the "parallel" batch axis feed both v7x
    TensorCores; on v5e/v6e it just amortizes per-step overhead less, which is
    fine because each step is already large.
    """
    best = None
    for d in range(8, min(B, max_tm) + 1, 8):
        if B % d == 0 and B // d >= 2:
            best = d
    if best is None:
        best = B  # tiny batch: single step
    return best


def mlp_forward(x, w1, b1, w2, b2, *, tm=None, bf16_epilogue=False,
                out_dtype=jnp.bfloat16):
    B, IN = x.shape
    H = w1.shape[1]
    OUT = w2.shape[1]
    if tm is None:
        tm = _choose_tm(B)
    assert B % tm == 0, "batch must be a multiple of the batch tile"

    grid = (B // tm,)

    # Advisory cost hint: ~34 MFLOP-scale kernel, let XLA overlap it.
    itemsize = lambda a: a.dtype.itemsize
    bytes_accessed = (x.size * itemsize(x) + w1.size * itemsize(w1)
                      + b1.size * itemsize(b1) + w2.size * itemsize(w2)
                      + b2.size * itemsize(b2)
                      + B * OUT * jnp.dtype(out_dtype).itemsize)
    cost = pl.CostEstimate(flops=2 * B * IN * H + 2 * B * H * OUT,
                           transcendentals=0,
                           bytes_accessed=bytes_accessed)

    kernel = functools.partial(mlp_kernel, bf16_epilogue=bf16_epilogue)

    return pl.pallas_call(
        kernel,
        out_shape=jax.ShapeDtypeStruct((B, OUT), out_dtype),
        grid_spec=pltpu.PrefetchScalarGridSpec(
            num_scalar_prefetch=0,
            grid=grid,
            in_specs=[
                pl.BlockSpec((tm, IN), lambda i: (i, 0)),   # x: tiled over batch
                pl.BlockSpec((IN, H), lambda i: (0, 0)),    # W1: VMEM-resident
                pl.BlockSpec((1, H), lambda i: (0, 0)),     # b1: VMEM-resident
                pl.BlockSpec((H, OUT), lambda i: (0, 0)),   # W2: VMEM-resident
                pl.BlockSpec((1, OUT), lambda i: (0, 0)),   # b2: VMEM-resident
            ],
            out_specs=pl.BlockSpec((tm, OUT), lambda i: (i, 0)),
        ),
        compiler_params=pltpu.CompilerParams(
            dimension_semantics=("parallel",),              # 2 TCs on v7x
        ),
        cost_estimate=cost,
    )(x, w1, b1, w2, b2)


def _bf16_epilogue_ok():
    """bf16 VALUs exist on v6e/v7x; keep the f32 path on v5e and older."""
    try:
        kind = jax.devices()[0].device_kind.lower()
    except Exception:
        return False
    return ("v6" in kind) or ("v7" in kind)


# --------------------------- OptimizerWrapper ------------------------------ #
def apply_optimizer(param_groups):
    # torch.ops.poptorch.optimizer_group is an IPU graph annotation with no
    # numerical effect; there is nothing to compute on TPU.
    # TODO(synk): poptorch.optimizer_group has no Pallas/TPU equivalent (graph
    # annotation only) — intentionally a no-op here.
    for _index, _group in enumerate(param_groups):
        pass


class OptimizerWrapper:
    """JAX analogue of the PyTorch OptimizerWrapper: run model, tag optimizer."""

    def __init__(self, model_fn, params, param_groups):
        self.model_fn = model_fn
        self.params = params
        self.param_groups = param_groups

    def forward(self, *args):
        out = self.model_fn(self.params, *args)
        apply_optimizer(self.param_groups)
        return out

    __call__ = forward


# --------------------------------- main ------------------------------------ #
if __name__ == "__main__":
    key = jax.random.PRNGKey(0)
    k_x, k_w1, k_b1, k_w2, k_b2 = jax.random.split(key, 5)

    # MXU/lane-friendly sizes: 256-aligned features (fills the 2x256x256 MXU on
    # v6e/v7x), batch 256 -> tm=128, grid=(2,) so both v7x TCs get work.
    B, IN, H, OUT = 256, 256, 256, 256

    x = jax.random.normal(k_x, (B, IN), dtype=jnp.float32).astype(jnp.bfloat16)
    w1 = (jax.random.normal(k_w1, (IN, H), dtype=jnp.float32) * 0.1).astype(jnp.bfloat16)
    b1 = jax.random.normal(k_b1, (1, H), dtype=jnp.float32) * 0.1
    w2 = (jax.random.normal(k_w2, (H, OUT), dtype=jnp.float32) * 0.1).astype(jnp.bfloat16)
    b2 = jax.random.normal(k_b2, (1, OUT), dtype=jnp.float32) * 0.1

    params = {"w1": w1, "b1": b1, "w2": w2, "b2": b2}

    use_bf16_epilogue = _bf16_epilogue_ok()

    def model_fn(p, xin):
        return mlp_forward(xin, p["w1"], p["b1"], p["w2"], p["b2"],
                           bf16_epilogue=use_bf16_epilogue,
                           out_dtype=jnp.bfloat16)

    # "optimizer" param groups (mirrors torch optimizer.param_groups structure)
    param_groups = [{"params": [params["w1"], params["b1"]]},
                    {"params": [params["w2"], params["b2"]]}]

    wrapper = OptimizerWrapper(model_fn, params, param_groups)

    out = wrapper(x)
    out = jax.block_until_ready(out)

    # Correctness check against a plain-JAX reference using the SAME precision
    # recipe as the kernel (bf16 MXU operands, f32 accumulation, matching
    # epilogue precision, bf16 output).
    h_ref = jnp.dot(x, w1, preferred_element_type=jnp.float32)
    if use_bf16_epilogue:
        h_ref = jnp.maximum(h_ref.astype(jnp.bfloat16) + b1.astype(jnp.bfloat16), 0.0)
    else:
        h_ref = jnp.maximum(h_ref + b1, 0.0).astype(jnp.bfloat16)
    ref = (jnp.dot(h_ref, w2, preferred_element_type=jnp.float32) + b2
           ).astype(jnp.bfloat16)

    assert out.shape == (B, OUT)
    assert out.dtype == jnp.bfloat16
    assert jnp.allclose(out.astype(jnp.float32), ref.astype(jnp.float32),
                        atol=3e-2, rtol=3e-2)

    print("KERNEL_OK")
</pallas_src>

<mosaic_0001>
module attributes {stable_mosaic.version = 11 : i64} {
  func.func @mlp_kernel(%arg0: i32, %arg1: memref<128x256xbf16, #tpu.memory_space<vmem>>, %arg2: memref<256x256xbf16, #tpu.memory_space<vmem>>, %arg3: memref<1x256xf32, #tpu.memory_space<vmem>>, %arg4: memref<256x256xbf16, #tpu.memory_space<vmem>>, %arg5: memref<1x256xf32, #tpu.memory_space<vmem>>, %arg6: memref<128x256xbf16, #tpu.memory_space<vmem>>) attributes {dimension_semantics = [#tpu.dimension_semantics<parallel>], iteration_bounds = array<i64: 2>, scalar_prefetch = 0 : i64, scratch_operands = 0 : i64, tpu.core_type = #tpu.core_type<tc>, window_params = [{transform_indices = @transform_0, window_bounds = array<i64: 128, 256>}, {pipeline_mode = #tpu.pipeline_mode<synchronous>, transform_indices = @transform_1, window_bounds = array<i64: 256, 256>}, {pipeline_mode = #tpu.pipeline_mode<synchronous>, transform_indices = @transform_2, window_bounds = array<i64: 1, 256>}, {pipeline_mode = #tpu.pipeline_mode<synchronous>, transform_indices = @transform_3, window_bounds = array<i64: 256, 256>}, {pipeline_mode = #tpu.pipeline_mode<synchronous>, transform_indices = @transform_4, window_bounds = array<i64: 1, 256>}, {transform_indices = @transform_5, window_bounds = array<i64: 128, 256>}]} {
    %c0 = arith.constant 0 : index
    %c0_0 = arith.constant 0 : index
    %0 = vector.load %arg1[%c0, %c0_0] : memref<128x256xbf16, #tpu.memory_space<vmem>>, vector<128x256xbf16>
    %c0_1 = arith.constant 0 : index
    %c0_2 = arith.constant 0 : index
    %1 = vector.load %arg2[%c0_1, %c0_2] : memref<256x256xbf16, #tpu.memory_space<vmem>>, vector<256x256xbf16>
    %c0_3 = arith.constant 0 : index
    %c0_4 = arith.constant 0 : index
    %2 = vector.load %arg4[%c0_3, %c0_4] : memref<256x256xbf16, #tpu.memory_space<vmem>>, vector<256x256xbf16>
    %cst = arith.constant dense<0.000000e+00> : vector<128x256xf32>
    %3 = tpu.matmul %0, %1, %cst {dimension_numbers = #tpu.dot_dimension_numbers<[1], [0], [0], [1], [0, 0, 1, 1], [], []>} : vector<128x256xbf16>, vector<256x256xbf16>, vector<128x256xf32> -> vector<128x256xf32>
    %c0_5 = arith.constant 0 : index
    %c0_6 = arith.constant 0 : index
    %4 = vector.load %arg3[%c0_5, %c0_6] : memref<1x256xf32, #tpu.memory_space<vmem>>, vector<1x256xf32>
    %5 = vector.broadcast %4 : vector<1x256xf32> to vector<128x256xf32>
    %6 = arith.addf %3, %5 : vector<128x256xf32>
    %cst_7 = arith.constant 0.000000e+00 : f32
    %7 = vector.broadcast %cst_7 : f32 to vector<128x256xf32>
    %8 = arith.maximumf %6, %7 : vector<128x256xf32>
    %9 = arith.truncf %8 : vector<128x256xf32> to vector<128x256xbf16>
    %cst_8 = arith.constant dense<0.000000e+00> : vector<128x256xf32>
    %10 = tpu.matmul %9, %2, %cst_8 {dimension_numbers = #tpu.dot_dimension_numbers<[1], [0], [0], [1], [0, 0, 1, 1], [], []>} : vector<128x256xbf16>, vector<256x256xbf16>, vector<128x256xf32> -> vector<128x256xf32>
    %c0_9 = arith.constant 0 : index
    %c0_10 = arith.constant 0 : index
    %11 = vector.load %arg5[%c0_9, %c0_10] : memref<1x256xf32, #tpu.memory_space<vmem>>, vector<1x256xf32>
    %12 = vector.broadcast %11 : vector<1x256xf32> to vector<128x256xf32>
    %13 = arith.addf %10, %12 : vector<128x256xf32>
    %14 = arith.truncf %13 : vector<128x256xf32> to vector<128x256xbf16>
    %c0_11 = arith.constant 0 : index
    %c0_12 = arith.constant 0 : index
    %15 = vector.load %arg6[%c0_11, %c0_12] : memref<128x256xbf16, #tpu.memory_space<vmem>>, vector<128x256xbf16>
    tpu.vector_store %arg6[%c0_11, %c0_12], %14 {strides = array<i32>} : memref<128x256xbf16, #tpu.memory_space<vmem>>, vector<128x256xbf16>,
    return
  }
  func.func @transform_0(%arg0: i32) -> (i32, i32) {
    %c0_i32 = arith.constant 0 : i32
    %c0_i32_0 = arith.constant 0 : i32
    return %arg0, %c0_i32 : i32, i32
  }
  func.func @transform_1(%arg0: i32) -> (i32, i32) {
    %c0_i32 = arith.constant 0 : i32
    %c0_i32_0 = arith.constant 0 : i32
    %c0_i32_1 = arith.constant 0 : i32
    return %c0_i32, %c0_i32_0 : i32, i32
  }
  func.func @transform_2(%arg0: i32) -> (i32, i32) {
    %c0_i32 = arith.constant 0 : i32
    %c0_i32_0 = arith.constant 0 : i32
    %c0_i32_1 = arith.constant 0 : i32
    return %c0_i32, %c0_i32_0 : i32, i32
  }
  func.func @transform_3(%arg0: i32) -> (i32, i32) {
    %c0_i32 = arith.constant 0 : i32
    %c0_i32_0 = arith.constant 0 : i32
    %c0_i32_1 = arith.constant 0 : i32
    return %c0_i32, %c0_i32_0 : i32, i32
  }
  func.func @transform_4(%arg0: i32) -> (i32, i32) {
    %c0_i32 = arith.constant 0 : i32
    %c0_i32_0 = arith.constant 0 : i32
    %c0_i32_1 = arith.constant 0 : i32
    return %c0_i32, %c0_i32_0 : i32, i32
  }
  func.func @transform_5(%arg0: i32) -> (i32, i32) {
    %c0_i32 = arith.constant 0 : i32
    %c0_i32_0 = arith.constant 0 : i32
    return %arg0, %c0_i32 : i32, i32
  }
}

</mosaic_0001>

<bundles_post_ra>
// kernel: tpu_custom_call.1
= control target key start
LH: loop header
LB: loop body
LE: loop exit
PB: predicated region body
PF: predicated region fallthrough
CT: control target
= control target key end

     0   :  { %10 = vsyncpa [#allocation3], 0  ;;  %s2418_s0 = inlined_call_operand.hbm [shape: bf16[256,256], index: 0, kind: input, shape index: {}]   ;;  %s2419_s1 = inlined_call_operand.hbm [shape: bf16[256,256], index: 1, kind: input, shape index: {}]   ;;  %s2420_s2 = inlined_call_operand.hbm [shape: f32[1,256], index: 2, kind: input, shape index: {}]   ;;  %s2421_s3 = inlined_call_operand.hbm [shape: bf16[256,256], index: 3, kind: input, shape index: {}]   ;;  %s2422_s4 = inlined_call_operand.vmem [shape: f32[1,256], index: 4, kind: input, shape index: {}]   ;;  %s2423_s5 = inlined_call_operand.hbm [shape: bf16[256,256], index: 5, kind: output, shape index: {}]  }
   0x1   :  { %12 = vsyncpa [#allocation3 + $0x1], 0 }
   0x2   :  { %13 = vsyncpa [#allocation6], 0 }
   0x3   :  { %14 = vsyncpa [#allocation9], 0 }
   0x4   :  { %15 = vsyncpa [#allocation4], 0 }
   0x5   :  { %17 = vsyncpa [#allocation4 + $0x1], 0  ;;  %s2119_s18 = smov 0   ;;  %s2121_s19 = smov 0  }
   0x6   :  { %s2123_s20 = smov 0   ;;  %s2125_s21 = smov 0  }
   0x7 LB: > { %s2140_s22 = sadd.s32 4294967295, %s2080_s21   ;;  %s1379_s23 = sadd.s32 4294967294, %s2080_s21   ;;  %s2080_s21 = sphi %s2125_s21, %s2436_s21   ;;  %s2076_s20 = sphi %s2123_s20, %s2435_s20   ;;  %s2072_s19 = sphi %s2121_s19, %s2434_s19   ;;  %s2068_s18 = sphi %s2119_s18, %s2433_s18  }
   0x8   : > { %p43_p0 = scmp.ne.s32.totalorder %s2072_s19, %s2068_s18  ;;  %p44_p1 = scmp.eq.s32.totalorder %s2140_s22, 0 }
   0x9   : > { %p151_p2 = scmp.eq.s32.totalorder %s2140_s22, 1  ;;  %p157_p3 = scmp.eq.s32.totalorder %s1379_s23, 1 }
   0xa   : > { %p2149_p4 = por %p44_p1, %p43_p0  ;;  %p1380_p5 = scmp.ge.s32.totalorder %s2080_s21, 1 }
   0xb   : > { %p2154_p6 = por %p157_p3, %p43_p0  ;;  %p164_p7 = scmp.lt.s32.totalorder %s2080_s21, 3 }
   0xc   : > { %s175_s28 = sshll.u32 %s2419_s1, 4  ;;  %s2082_s30 = smov [#allocation5]   ;;  %s176_s28 = int_to_ptr.hbm [resolvable:$true] %s175_s28 }
   0xd   : > { %p2162_p8 = pnand %p1380_p5, %p164_p7  ;;  %s177_s6 = sshll.u32 %s2082_s30, 4  ;;  %s178_s6 = int_to_ptr.vmem [resolvable:$true] %s177_s6 }
   0xe   : > { %s190_s10 = sshll.u32 %s2420_s2, 4  ;;  %s2424_s11 = smov 128   ;;  %s191_s10 = int_to_ptr.hbm [resolvable:$true] %s190_s10 }
   0xf   : > { %p1821_p9 = pneg %p2162_p8  ;;  %s2084_s12 = smov 8  }
  0x10   : > { %s2085_s13 = smov [#allocation7]   ;;  %s201_s17 = sshll.u32 %s2421_s3, 4  ;;  %s202_s17 = int_to_ptr.hbm [resolvable:$true] %s201_s17 }
  0x11   : > { %p2170_p10 = pnand %p1821_p9, %p44_p1  ;;  %s192_s14 = sshll.u32 %s2085_s13, 4  ;;  %s193_s14 = int_to_ptr.vmem [resolvable:$true] %s192_s14 }
  0x12   : > { %s2086_s23 = smov [#allocation8]   ;;  %s2189_s27 = sadd.s32 1, %s2080_s21  }
  0x13   : > { %1824 = dma.hbm_to_vmem [thread:$0]  (!%p2170_p10), %s176_s28, 4096, %s178_s6, [#allocation6], %s2424_s11, %s2424_s11, %s2084_s12  }
  0x14   : > { %1827 = dma.hbm_to_vmem [thread:$0]  (!%p2170_p10), %s191_s10, 32, %s193_s14, [#allocation6]  }
  0x15   : > { %s203_s26 = sshll.u32 %s2086_s23, 4  ;;  %s27_s28 = ssub.s32 %s2080_s21, %s2189_s27  ;;  %s204_s26 = int_to_ptr.vmem [resolvable:$true] %s203_s26 }
  0x16   : > { %1830 = dma.hbm_to_vmem [thread:$0]  (!%p2170_p10), %s202_s17, 4096, %s204_s26, [#allocation9], %s2424_s11, %s2424_s11, %s2084_s12  }
  0x17   : > { %s30_s30 = sadd.s32 1, %s2076_s20  ;;  %p28_p12 = scmp.eq.s32.totalorder %s27_s28, 0 }
  0x18   : > { %p37_p13 = scmp.ne.s32.totalorder %s2076_s20, %s2072_s19  ;;  %p38_p0 = scmp.eq.s32.totalorder %s2080_s21, 0 }
  0x19   : > { %s2203_s6 = scalar_select %p28_p12, %s2076_s20, %s30_s30  }
  0x1a   : > { %p2207_p3 = por %p151_p2, %p37_p13  ;;  %p1842_p5 = scmp.lt.s32.totalorder %s2080_s21, 2 }
  0x1b   : > { %s220_s9 = sand.u32 1, %s2076_s20   ;;  %s1722_s7 = sshll.u32 %s2080_s21, 7 }
  0x1c   : > { %p39_p7 = por %p38_p0, %p37_p13  ;;  %s1385_s10 = sshll.u32 %s220_s9, 7 }
  0x1d   : > { %s230_s15 = scalar_lea.hbm %s2418_s0, %s1722_s7  ;;  %s224_s17 = scalar_lea.vmem [#allocation2], %s1385_s10 }
  0x1e   : > { %s231_s16 = sshll.u32 %s230_s15, 4  ;;  %s233_s23 = sshll.u32 %s224_s17, 4  ;;  %s232_s16 = int_to_ptr.hbm [resolvable:$true] %s231_s16  ;;  %s234_s23 = int_to_ptr.vmem [resolvable:$true] %s233_s23 }
  0x1f   : > { %p2217_p9 = pnand %p1842_p5, %p39_p7  ;;  %s221_s28 = scalar_lea.sflag [#allocation3], %s220_s9 }
  0x20   : > { %s1976_s30 = sshra.s32 %s232_s16, 4  ;;  %s1983_s10 = scalar_lea.hbm %s2418_s0, 256  ;;  %s1977_s30 = int_to_ptr.hbm [resolvable:$true] %s1976_s30 }
  0x21   : > { %s1978_s11 = scalar_lea.hbm %s1977_s30, 128  ;;  %p1980_p10 = pneg %p2217_p9 }
  0x22   : > { %p1979_p2 = scmp.ne.s32.totalorder %s1977_s30, %s1978_s11  ;;  %p1984_p0 = scmp.lt.s32.totalorder %s1977_s30, %s2418_s0 }
  0x23   : > { %p1985_p5 = scmp.lt.s32.totalorder %s1983_s10, %s1978_s11 }
  0x24   : > { %p1981_p12 = pnand %p1980_p10, %p1979_p2 }
  0x25   : > { %p1986_p7 = por %p1985_p5, %p1984_p0 }
  0x26   : > { %p1982_p13 = pneg %p1981_p12 }
  0x28   : > { %p1987_p11 = pnand %p1986_p7, %p1982_p13 }
  0x2a   : > { %1990 = shalt.err (!%p1987_p11)
}
  0x2b   : > { %s2431_s9 = smov 128   ;;  %245 = sbr.rel (%p2162_p8) target bundleno = 497 (0x1f1), region = 40 }
  0x2c   : > { %1834 = dma.hbm_to_vmem [thread:$0]  (!%p2217_p9), %s232_s16, 2048, %s234_s23, %s221_s28, %s2431_s9, %s2431_s9, %s2084_s12  }
  0x2d   : > { %s2237_s17 = sand.u32 (!%p2162_p8), 1, %s2072_s19  }
  0x2e   : > { %s1390_s11 = sshll.u32 (!%p2162_p8), %s2237_s17, 7  ;;  %s248_s30 = scalar_lea.sflag (!%p2162_p8), [#allocation3], %s2237_s17 }
  0x2f   : > { %s2243_s7 = scalar_lea.vmem (!%p2162_p8), [#allocation2], %s1390_s11 }
  0x30   : > { %2051 = dma.done.wait (%p2149_p4), %s248_s30, 2048  }
  0x31   : > { %2053 = vsyncadd (%p2149_p4), %s248_s30, 4294965248 }
  0x32   : > { %2055 = dma.done.wait (%p44_p1), [#allocation6], 4128  }
  0x33   : > { %2057 = vsyncadd (%p44_p1), [#allocation6], 4294963168 }
  0x34   : > { %2059 = dma.done.wait (%p44_p1), [#allocation9], 4096  }
  0x35   : > { %2061 = vsyncadd (%p44_p1), [#allocation9], 4294963200  ;;  %v1517_v0 = vld [vmem:[#allocation5 + $0x70] sm:$0xf]  ;;  %v1754_v1 = vld [vmem:[#allocation5 + $0x74] sm:$0xf0] }
  0x36   : > { %v1581_v2 = vld [vmem:[#allocation5 + $0xf0] sm:$0xf]  ;;  %v1518_v3 = vor.u32 %v1754_v1, %v1517_v0  ;;  %v1770_v4 = vld [vmem:[#allocation5 + $0xf4] sm:$0xf0]  ;;  %v1753_v5 = vld [vmem:[#allocation5 + $0x74] sm:$0xf] }
  0x37   : > { %v1519_v6 = vld [vmem:[#allocation5 + $0x78] sm:$0xf0]  ;;  %v1582_v7 = vor.u32 %v1770_v4, %v1581_v2  ;;  %v1769_v9 = vld [vmem:[#allocation5 + $0xf4] sm:$0xf]  ;;  %v1509_v11 = vld [vmem:[#allocation5 + $0x60] sm:$0xf] }
  0x38   : > { %v1522_v8 = vor.u32 %v1753_v5, %v1519_v6  ;;  %v1583_v10 = vld [vmem:[#allocation5 + $0xf8] sm:$0xf0]  ;;  %622 = vmatpush.bf16.msra.mxu0 %v1518_v3  ;;  %v1752_v13 = vld [vmem:[#allocation5 + $0x64] sm:$0xf0]  ;;  %v1573_v14 = vld [vmem:[#allocation5 + $0xe0] sm:$0xf] }
  0x39   : > { %v1586_v12 = vor.u32 %v1769_v9, %v1583_v10  ;;  %v1768_v15 = vld [vmem:[#allocation5 + $0xe4] sm:$0xf0]  ;;  %671 = vmatpush.bf16.msra.mxu1 %v1582_v7  ;;  %v1510_v16 = vor.u32 %v1752_v13, %v1509_v11  ;;  %v1751_v18 = vld [vmem:[#allocation5 + $0x64] sm:$0xf]  ;;  %v1511_v19 = vld [vmem:[#allocation5 + $0x68] sm:$0xf0] }
  0x3a   : > { %720 = vmatpush.bf16.msra.mxu2 %v1522_v8  ;;  %v1574_v17 = vor.u32 %v1768_v15, %v1573_v14  ;;  %v1767_v20 = vld [vmem:[#allocation5 + $0xe4] sm:$0xf]  ;;  %v1514_v21 = vor.u32 %v1751_v18, %v1511_v19  ;;  %v1575_v22 = vld [vmem:[#allocation5 + $0xe8] sm:$0xf0]  ;;  %v1501_v23 = vld [vmem:[#allocation5 + $0x50] sm:$0xf] }
  0x3b   : > { %769 = vmatpush.bf16.msra.mxu3 %v1586_v12  ;;  %v1750_v24 = vld [vmem:[#allocation5 + $0x54] sm:$0xf0]  ;;  %v1578_v25 = vor.u32 %v1767_v20, %v1575_v22  ;;  %v1565_v26 = vld [vmem:[#allocation5 + $0xd0] sm:$0xf]  ;;  %v1749_v28 = vld [vmem:[#allocation5 + $0x54] sm:$0xf] }
  0x3c   : > { %v1766_v27 = vld [vmem:[#allocation5 + $0xd4] sm:$0xf0]  ;;  %623 = vmatpush.bf16.msra.mxu0 %v1510_v16  ;;  %v1502_v29 = vor.u32 %v1750_v24, %v1501_v23  ;;  %v1503_v30 = vld [vmem:[#allocation5 + $0x58] sm:$0xf0]  ;;  %v1765_v31 = vld [vmem:[#allocation5 + $0xd4] sm:$0xf] }
  0x3d   : > { %v1567_v32 = vld [vmem:[#allocation5 + $0xd8] sm:$0xf0]  ;;  %672 = vmatpush.bf16.msra.mxu1 %v1574_v17  ;;  %v1566_v33 = vor.u32 %v1766_v27, %v1565_v26  ;;  %v1506_v34 = vor.u32 %v1749_v28, %v1503_v30  ;;  %v1493_v35 = vld [vmem:[#allocation5 + $0x40] sm:$0xf]  ;;  %v1748_v36 = vld [vmem:[#allocation5 + $0x44] sm:$0xf0] }
  0x3e   : > { %721 = vmatpush.bf16.msra.mxu2 %v1514_v21  ;;  %v1557_v37 = vld [vmem:[#allocation5 + $0xc0] sm:$0xf]  ;;  %v1570_v38 = vor.u32 %v1765_v31, %v1567_v32  ;;  %v1764_v39 = vld [vmem:[#allocation5 + $0xc4] sm:$0xf0]  ;;  %v1747_v40 = vld [vmem:[#allocation5 + $0x44] sm:$0xf]  ;;  %v1494_v44 = vor.u32 %v1748_v36, %v1493_v35 }
  0x3f   : > { %770 = vmatpush.bf16.msra.mxu3 %v1578_v25  ;;  %v1495_v41 = vld [vmem:[#allocation5 + $0x48] sm:$0xf0]  ;;  %v1763_v42 = vld [vmem:[#allocation5 + $0xc4] sm:$0xf]  ;;  %v1558_v45 = vor.u32 %v1764_v39, %v1557_v37  ;;  %v1485_v47 = vld [vmem:[#allocation5 + $0x30] sm:$0xf] }
  0x40   : > { %v1559_v43 = vld [vmem:[#allocation5 + $0xc8] sm:$0xf0]  ;;  %624 = vmatpush.bf16.msra.mxu0 %v1502_v29  ;;  %v1498_v46 = vor.u32 %v1747_v40, %v1495_v41  ;;  %v1746_v48 = vld [vmem:[#allocation5 + $0x34] sm:$0xf0]  ;;  %v1549_v49 = vld [vmem:[#allocation5 + $0xb0] sm:$0xf] }
  0x41   : > { %673 = vmatpush.bf16.msra.mxu1 %v1566_v33  ;;  %v1562_v50 = vor.u32 %v1763_v42, %v1559_v43  ;;  %v1762_v51 = vld [vmem:[#allocation5 + $0xb4] sm:$0xf0]  ;;  %v1745_v52 = vld [vmem:[#allocation5 + $0x34] sm:$0xf]  ;;  %v1487_v53 = vld [vmem:[#allocation5 + $0x38] sm:$0xf0]  ;;  %v1486_v56 = vor.u32 %v1746_v48, %v1485_v47 }
  0x42   : > { %722 = vmatpush.bf16.msra.mxu2 %v1506_v34  ;;  %v1761_v54 = vld [vmem:[#allocation5 + $0xb4] sm:$0xf]  ;;  %v1551_v55 = vld [vmem:[#allocation5 + $0xb8] sm:$0xf0]  ;;  %v1550_v57 = vor.u32 %v1762_v51, %v1549_v49  ;;  %v1490_v58 = vor.u32 %v1745_v52, %v1487_v53  ;;  %v1477_v59 = vld [vmem:[#allocation5 + $0x20] sm:$0xf] }
  0x43   : > { %771 = vmatpush.bf16.msra.mxu3 %v1570_v38  ;;  %v1744_v60 = vld [vmem:[#allocation5 + $0x24] sm:$0xf0]  ;;  %v1541_v61 = vld [vmem:[#allocation5 + $0xa0] sm:$0xf]  ;;  %v1554_v62 = vor.u32 %v1761_v54, %v1551_v55  ;;  %v1743_v0 = vld [vmem:[#allocation5 + $0x24] sm:$0xf] }
  0x44   : > { %625 = vmatpush.bf16.msra.mxu0 %v1494_v44  ;;  %v1760_v63 = vld [vmem:[#allocation5 + $0xa4] sm:$0xf0]  ;;  %v1479_v1 = vld [vmem:[#allocation5 + $0x28] sm:$0xf0]  ;;  %v1759_v2 = vld [vmem:[#allocation5 + $0xa4] sm:$0xf]  ;;  %v1478_v4 = vor.u32 %v1744_v60, %v1477_v59 }
  0x45   : > { %674 = vmatpush.bf16.msra.mxu1 %v1558_v45  ;;  %v1543_v3 = vld [vmem:[#allocation5 + $0xa8] sm:$0xf0]  ;;  %v1542_v5 = vor.u32 %v1760_v63, %v1541_v61  ;;  %v1482_v6 = vor.u32 %v1743_v0, %v1479_v1  ;;  %v1469_v7 = vld [vmem:[#allocation5 + $0x10] sm:$0xf]  ;;  %v1742_v8 = vld [vmem:[#allocation5 + $0x14] sm:$0xf0] }
  0x46   : > { %723 = vmatpush.bf16.msra.mxu2 %v1498_v46  ;;  %v1533_v9 = vld [vmem:[#allocation5 + $0x90] sm:$0xf]  ;;  %v1546_v10 = vor.u32 %v1759_v2, %v1543_v3  ;;  %v1758_v11 = vld [vmem:[#allocation5 + $0x94] sm:$0xf0]  ;;  %v1741_v12 = vld [vmem:[#allocation5 + $0x14] sm:$0xf]  ;;  %v1470_v16 = vor.u32 %v1742_v8, %v1469_v7 }
  0x47   : > { %772 = vmatpush.bf16.msra.mxu3 %v1562_v50  ;;  %v1471_v13 = vld [vmem:[#allocation5 + $0x18] sm:$0xf0]  ;;  %v1757_v14 = vld [vmem:[#allocation5 + $0x94] sm:$0xf]  ;;  %v1461_v17 = vld [vmem:[#allocation5] sm:$0xf]  ;;  %v1534_v19 = vor.u32 %v1758_v11, %v1533_v9 }
  0x48   : > { %626 = vmatpush.bf16.msra.mxu0 %v1486_v56  ;;  %v1535_v15 = vld [vmem:[#allocation5 + $0x98] sm:$0xf0]  ;;  %v1740_v18 = vld [vmem:[#allocation5 + $0x4] sm:$0xf0]  ;;  %v1474_v20 = vor.u32 %v1741_v12, %v1471_v13  ;;  %v1525_v21 = vld [vmem:[#allocation5 + $0x80] sm:$0xf] }
  0x49   : > { %675 = vmatpush.bf16.msra.mxu1 %v1550_v57  ;;  %v1756_v22 = vld [vmem:[#allocation5 + $0x84] sm:$0xf0]  ;;  %v1739_v23 = vld [vmem:[#allocation5 + $0x4] sm:$0xf]  ;;  %v1538_v24 = vor.u32 %v1757_v14, %v1535_v15  ;;  %v1463_v25 = vld [vmem:[#allocation5 + $0x8] sm:$0xf0]  ;;  %v1462_v31 = vor.u32 %v1740_v18, %v1461_v17 }
  0x4a   : > { %724 = vmatpush.bf16.msra.mxu2 %v1490_v58  ;;  %v1755_v26 = vld [vmem:[#allocation5 + $0x84] sm:$0xf]  ;;  %v1527_v27 = vld [vmem:[#allocation5 + $0x88] sm:$0xf0]  ;;  %v1397_v28 = vld [vmem:[%s2243_s7] sm:$0xf]  ;;  %v1526_v35 = vor.u32 %v1756_v22, %v1525_v21  ;;  %v1466_v36 = vor.u32 %v1739_v23, %v1463_v25 }
  0x4b   : > { %773 = vmatpush.bf16.msra.mxu3 %v1554_v62  ;;  %v1785_v29 = vld [vmem:[#allocation8 + $0x74] sm:$0xf]  ;;  %v1647_v30 = vld [vmem:[#allocation8 + $0x78] sm:$0xf0]  ;;  %v1724_v32 = vld [vmem:[%s2243_s7 + $0x4] sm:$0xf0]  ;;  %v1530_v39 = vor.u32 %v1755_v26, %v1527_v27 }
  0x4c   : > { %627 = vmatpush.bf16.msra.mxu0 %v1478_v4  ;;  %v1801_v33 = vld [vmem:[#allocation8 + $0xf4] sm:$0xf]  ;;  %v1711_v34 = vld [vmem:[#allocation8 + $0xf8] sm:$0xf0]  ;;  %v1723_v37 = vld [vmem:[%s2243_s7 + $0x4] sm:$0xf]  ;;  %v1650_v40 = vor.u32 %v1785_v29, %v1647_v30  ;;  %v1398_v43 = vor.u32 %v1724_v32, %v1397_v28 }
  0x4d   : > { %676 = vmatpush.bf16.msra.mxu1 %v1542_v5  ;;  %v1399_v38 = vld [vmem:[%s2243_s7 + $0x8] sm:$0xf0]  ;;  %v1645_v41 = vld [vmem:[#allocation8 + $0x70] sm:$0xf]  ;;  %v1786_v42 = vld [vmem:[#allocation8 + $0x74] sm:$0xf0]  ;;  %v1714_v44 = vor.u32 %v1801_v33, %v1711_v34 }
  0x4e   : > { %725 = vmatpush.bf16.msra.mxu2 %v1482_v6  ;;  %v1709_v45 = vld [vmem:[#allocation8 + $0xf0] sm:$0xf]  ;;  %v1802_v46 = vld [vmem:[#allocation8 + $0xf4] sm:$0xf0]  ;;  %v1402_v47 = vor.u32 %v1723_v37, %v1399_v38  ;;  %v1646_v48 = vor.u32 %v1786_v42, %v1645_v41  ;;  %v1783_v50 = vld [vmem:[#allocation8 + $0x64] sm:$0xf] }
  0x4f   : > { %774 = vmatpush.bf16.msra.mxu3 %v1546_v10  ;;  %v1710_v49 = vor.u32 %v1802_v46, %v1709_v45  ;;  %v1639_v51 = vld [vmem:[#allocation8 + $0x68] sm:$0xf0]  ;;  %v1799_v52 = vld [vmem:[#allocation8 + $0xe4] sm:$0xf]  ;;  %v1637_v55 = vld [vmem:[#allocation8 + $0x60] sm:$0xf] }
  0x50   : > { %628 = vmatpush.bf16.msra.mxu0 %v1470_v16  ;;  %v1642_v53 = vor.u32 %v1783_v50, %v1639_v51  ;;  %v1703_v54 = vld [vmem:[#allocation8 + $0xe8] sm:$0xf0]  ;;  %v1784_v56 = vld [vmem:[#allocation8 + $0x64] sm:$0xf0]  ;;  %v1701_v59 = vld [vmem:[#allocation8 + $0xe0] sm:$0xf] }
  0x51   : > { %677 = vmatpush.bf16.msra.mxu1 %v1534_v19  ;;  %v1706_v57 = vor.u32 %v1799_v52, %v1703_v54  ;;  %v1638_v58 = vor.u32 %v1784_v56, %v1637_v55  ;;  %v1800_v60 = vld [vmem:[#allocation8 + $0xe4] sm:$0xf0]  ;;  %v1405_v62 = vld [vmem:[%s2243_s7 + $0x10] sm:$0xf]  ;;  %v1726_v63 = vld [vmem:[%s2243_s7 + $0x14] sm:$0xf0] }
  0x52   : > { %726 = vmatpush.bf16.msra.mxu2 %v1474_v20  ;;  %v1702_v61 = vor.u32 %v1800_v60, %v1701_v59  ;;  %v1725_v0 = vld [vmem:[%s2243_s7 + $0x14] sm:$0xf]  ;;  %v1407_v1 = vld [vmem:[%s2243_s7 + $0x18] sm:$0xf0]  ;;  %v1406_v2 = vor.u32 %v1726_v63, %v1405_v62  ;;  %v1413_v16 = vld [vmem:[%s2243_s7 + $0x20] sm:$0xf] }
  0x53   : > { %775 = vmatpush.bf16.msra.mxu3 %v1538_v24  ;;  %v1410_v3 = vor.u32 %v1725_v0, %v1407_v1  ;;  %v1781_v4 = vld [vmem:[#allocation8 + $0x54] sm:$0xf]  ;;  %v1631_v5 = vld [vmem:[#allocation8 + $0x58] sm:$0xf0]  ;;  %v1629_v9 = vld [vmem:[#allocation8 + $0x50] sm:$0xf] }
  0x54   : > { %629 = vmatpush.bf16.msra.mxu0 %v1462_v31  ;;  %v1797_v6 = vld [vmem:[#allocation8 + $0xd4] sm:$0xf]  ;;  %v1634_v7 = vor.u32 %v1781_v4, %v1631_v5  ;;  %v1695_v8 = vld [vmem:[#allocation8 + $0xd8] sm:$0xf0]  ;;  %v1782_v10 = vld [vmem:[#allocation8 + $0x54] sm:$0xf0] }
  0x55   : > { %678 = vmatpush.bf16.msra.mxu1 %v1526_v35  ;;  %v1698_v11 = vor.u32 %v1797_v6, %v1695_v8  ;;  %v1630_v12 = vor.u32 %v1782_v10, %v1629_v9  ;;  %v1693_v13 = vld [vmem:[#allocation8 + $0xd0] sm:$0xf]  ;;  %v1798_v14 = vld [vmem:[#allocation8 + $0xd4] sm:$0xf0]  ;;  %v1728_v17 = vld [vmem:[%s2243_s7 + $0x24] sm:$0xf0] }
  0x56   : > { %727 = vmatpush.bf16.msra.mxu2 %v1466_v36  ;;  %v1694_v15 = vor.u32 %v1798_v14, %v1693_v13  ;;  %v1727_v18 = vld [vmem:[%s2243_s7 + $0x24] sm:$0xf]  ;;  %v1415_v19 = vld [vmem:[%s2243_s7 + $0x28] sm:$0xf0]  ;;  %v1414_v20 = vor.u32 %v1728_v17, %v1413_v16  ;;  %v1421_v34 = vld [vmem:[%s2243_s7 + $0x30] sm:$0xf] }
  0x57   : > { %776 = vmatpush.bf16.msra.mxu3 %v1530_v39  ;;  %630 = vmatmul.bf16.vlgmr.msra.gmra.mxu0 %v1398_v43  ;;  %v1418_v21 = vor.u32 %v1727_v18, %v1415_v19  ;;  %v1779_v22 = vld [vmem:[#allocation8 + $0x44] sm:$0xf]  ;;  %v1623_v23 = vld [vmem:[#allocation8 + $0x48] sm:$0xf0]  ;;  %v1621_v27 = vld [vmem:[#allocation8 + $0x40] sm:$0xf] }
  0x58   : > { %679 = vmatmul.bf16.vlgmr.msra.gmra.mxu1 %v1402_v47  ;;  %1032 = vmatpush.bf16.msrb.mxu0 %v1646_v48  ;;  %v1795_v24 = vld [vmem:[#allocation8 + $0xc4] sm:$0xf]  ;;  %v1626_v25 = vor.u32 %v1779_v22, %v1623_v23  ;;  %v1687_v26 = vld [vmem:[#allocation8 + $0xc8] sm:$0xf0]  ;;  %v1780_v28 = vld [vmem:[#allocation8 + $0x44] sm:$0xf0] }
  0x59   : > { %728 = vmatmul.bf16.vlgmr.msra.gmra.mxu2 %v1398_v43  ;;  %1081 = vmatpush.bf16.msrb.mxu1 %v1710_v49  ;;  %v1690_v29 = vor.u32 %v1795_v24, %v1687_v26  ;;  %v1622_v30 = vor.u32 %v1780_v28, %v1621_v27  ;;  %v1685_v31 = vld [vmem:[#allocation8 + $0xc0] sm:$0xf]  ;;  %v1796_v32 = vld [vmem:[#allocation8 + $0xc4] sm:$0xf0]  ;;  %v1730_v35 = vld [vmem:[%s2243_s7 + $0x34] sm:$0xf0] }
  0x5a   : > { %1130 = vmatpush.bf16.msrb.mxu2 %v1650_v40  ;;  %777 = vmatmul.bf16.vlgmr.msra.gmra.mxu3 %v1402_v47  ;;  %v1686_v33 = vor.u32 %v1796_v32, %v1685_v31  ;;  %v1729_v36 = vld [vmem:[%s2243_s7 + $0x34] sm:$0xf]  ;;  %v1423_v37 = vld [vmem:[%s2243_s7 + $0x38] sm:$0xf0]  ;;  %v1422_v38 = vor.u32 %v1730_v35, %v1421_v34  ;;  %v1429_v52 = vld [vmem:[%s2243_s7 + $0x40] sm:$0xf] }
  0x5b   : > { %1179 = vmatpush.bf16.msrb.mxu3 %v1714_v44  ;;  %v1426_v39 = vor.u32 %v1729_v36, %v1423_v37  ;;  %v1777_v40 = vld [vmem:[#allocation8 + $0x34] sm:$0xf]  ;;  %v1615_v41 = vld [vmem:[#allocation8 + $0x38] sm:$0xf0]  ;;  %v1613_v45 = vld [vmem:[#allocation8 + $0x30] sm:$0xf] }
  0x5c   : > { %1033 = vmatpush.bf16.msrb.mxu0 %v1638_v58  ;;  %v1793_v42 = vld [vmem:[#allocation8 + $0xb4] sm:$0xf]  ;;  %v1618_v43 = vor.u32 %v1777_v40, %v1615_v41  ;;  %v1679_v44 = vld [vmem:[#allocation8 + $0xb8] sm:$0xf0]  ;;  %v1778_v46 = vld [vmem:[#allocation8 + $0x34] sm:$0xf0] }
  0x5d   : > { %1082 = vmatpush.bf16.msrb.mxu1 %v1702_v61  ;;  %v1682_v47 = vor.u32 %v1793_v42, %v1679_v44  ;;  %v1614_v48 = vor.u32 %v1778_v46, %v1613_v45  ;;  %v1677_v49 = vld [vmem:[#allocation8 + $0xb0] sm:$0xf]  ;;  %v1794_v50 = vld [vmem:[#allocation8 + $0xb4] sm:$0xf0]  ;;  %v1731_v54 = vld [vmem:[%s2243_s7 + $0x44] sm:$0xf] }
  0x5e   : > { %1131 = vmatpush.bf16.msrb.mxu2 %v1642_v53  ;;  %v1678_v51 = vor.u32 %v1794_v50, %v1677_v49  ;;  %v1732_v53 = vld [vmem:[%s2243_s7 + $0x44] sm:$0xf0]  ;;  %v1431_v55 = vld [vmem:[%s2243_s7 + $0x48] sm:$0xf0]  ;;  %v1605_v63 = vld [vmem:[#allocation8 + $0x20] sm:$0xf] }
  0x5f   : > { %1180 = vmatpush.bf16.msrb.mxu3 %v1706_v57  ;;  %v1430_v56 = vor.u32 %v1732_v53, %v1429_v52  ;;  %v1434_v57 = vor.u32 %v1731_v54, %v1431_v55  ;;  %v1775_v58 = vld [vmem:[#allocation8 + $0x24] sm:$0xf]  ;;  %v1607_v59 = vld [vmem:[#allocation8 + $0x28] sm:$0xf0]  ;;  %v1776_v0 = vld [vmem:[#allocation8 + $0x24] sm:$0xf0] }
  0x60   : > { %1034 = vmatpush.bf16.msrb.mxu0 %v1630_v12  ;;  %v1791_v60 = vld [vmem:[#allocation8 + $0xa4] sm:$0xf]  ;;  %v1610_v61 = vor.u32 %v1775_v58, %v1607_v59  ;;  %v1671_v62 = vld [vmem:[#allocation8 + $0xa8] sm:$0xf0]  ;;  %v1792_v4 = vld [vmem:[#allocation8 + $0xa4] sm:$0xf0] }
  0x61   : > { %1083 = vmatpush.bf16.msrb.mxu1 %v1694_v15  ;;  %v1674_v1 = vor.u32 %v1791_v60, %v1671_v62  ;;  %v1437_v6 = vld [vmem:[%s2243_s7 + $0x50] sm:$0xf]  ;;  %v1733_v8 = vld [vmem:[%s2243_s7 + $0x54] sm:$0xf]  ;;  %v1439_v9 = vld [vmem:[%s2243_s7 + $0x58] sm:$0xf0] }
  0x62   : > { %1132 = vmatpush.bf16.msrb.mxu2 %v1634_v7  ;;  %v1734_v7 = vld [vmem:[%s2243_s7 + $0x54] sm:$0xf0]  ;;  %v1599_v13 = vld [vmem:[#allocation8 + $0x18] sm:$0xf0]  ;;  %v1597_v17 = vld [vmem:[#allocation8 + $0x10] sm:$0xf] }
  0x63   : > { %1181 = vmatpush.bf16.msrb.mxu3 %v1698_v11  ;;  %v1438_v10 = vor.u32 %v1734_v7, %v1437_v6  ;;  %v1442_v11 = vor.u32 %v1733_v8, %v1439_v9  ;;  %v1773_v12 = vld [vmem:[#allocation8 + $0x14] sm:$0xf]  ;;  %v1663_v16 = vld [vmem:[#allocation8 + $0x98] sm:$0xf0]  ;;  %v1774_v18 = vld [vmem:[#allocation8 + $0x14] sm:$0xf0] }
  0x64   : > { %1035 = vmatpush.bf16.msrb.mxu0 %v1622_v30  ;;  %v1789_v14 = vld [vmem:[#allocation8 + $0x94] sm:$0xf]  ;;  %v1602_v15 = vor.u32 %v1773_v12, %v1599_v13  ;;  %v1790_v22 = vld [vmem:[#allocation8 + $0x94] sm:$0xf0]  ;;  %v1445_v24 = vld [vmem:[%s2243_s7 + $0x60] sm:$0xf] }
  0x65   : > { %1084 = vmatpush.bf16.msrb.mxu1 %v1686_v33  ;;  %v1666_v19 = vor.u32 %v1789_v14, %v1663_v16  ;;  %v1735_v26 = vld [vmem:[%s2243_s7 + $0x64] sm:$0xf]  ;;  %v1447_v27 = vld [vmem:[%s2243_s7 + $0x68] sm:$0xf0]  ;;  %v1453_v33 = vld [vmem:[%s2243_s7 + $0x70] sm:$0xf] }
  0x66   : > { %1133 = vmatpush.bf16.msrb.mxu2 %v1626_v25  ;;  %v1736_v25 = vld [vmem:[%s2243_s7 + $0x64] sm:$0xf0]  ;;  %v1591_v31 = vld [vmem:[#allocation8 + $0x8] sm:$0xf0]  ;;  %v1738_v34 = vld [vmem:[%s2243_s7 + $0x74] sm:$0xf0] }
  0x67   : > { %635 = vmatmul.bf16.gmra.mxu0 %v1406_v2  ;;  %1182 = vmatpush.bf16.msrb.mxu3 %v1690_v29  ;;  %v1446_v28 = vor.u32 %v1736_v25, %v1445_v24  ;;  %v1450_v29 = vor.u32 %v1735_v26, %v1447_v27  ;;  %v1771_v30 = vld [vmem:[#allocation8 + $0x4] sm:$0xf]  ;;  %v1737_v35 = vld [vmem:[%s2243_s7 + $0x74] sm:$0xf]  ;;  %v1455_v36 = vld [vmem:[%s2243_s7 + $0x78] sm:$0xf0]  ;;  %v1454_v45 = vor.u32 %v1738_v34, %v1453_v33 }
  0x68   : > { %684 = vmatmul.bf16.gmra.mxu1 %v1410_v3  ;;  %1036 = vmatpush.bf16.msrb.mxu0 %v1614_v48  ;;  %v1594_v32 = vor.u32 %v1771_v30, %v1591_v31  ;;  %v1787_v37 = vld [vmem:[#allocation8 + $0x84] sm:$0xf]  ;;  %v1589_v40 = vld [vmem:[#allocation8] sm:$0xf]  ;;  %v1772_v41 = vld [vmem:[#allocation8 + $0x4] sm:$0xf0] }
  0x69   : > { %733 = vmatmul.bf16.gmra.mxu2 %v1406_v2  ;;  %1085 = vmatpush.bf16.msrb.mxu1 %v1678_v51  ;;  %v1606_v2 = vor.u32 %v1776_v0, %v1605_v63  ;;  %v1653_v42 = vld [vmem:[#allocation8 + $0x80] sm:$0xf]  ;;  %v1788_v44 = vld [vmem:[#allocation8 + $0x84] sm:$0xf0]  ;;  %v376_v48 = vld [vmem:[#allocation7] sm:$0x3] }
  0x6a   : > { %782 = vmatmul.bf16.gmra.mxu3 %v1410_v3  ;;  %1134 = vmatpush.bf16.msrb.mxu2 %v1618_v43  ;;  %v1669_v3 = vld [vmem:[#allocation8 + $0xa0] sm:$0xf]  ;;  %v1590_v43 = vor.u32 %v1772_v41, %v1589_v40  ;;  %v1654_v46 = vor.u32 %v1788_v44, %v1653_v42  ;;  %v2289_v50 = vperm.slane %v376_v48, 0  ;;  %v2292_v54 = vperm.slane %v376_v48, 1  ;;  %s2336_s12 = scalar_lea.vmem [#allocation10], %s1390_s11  ;;  %s1804_s16 = sshll.u32 %s2140_s22, 7 }
  0x6b   : > { %1183 = vmatpush.bf16.msrb.mxu3 %v1682_v47  ;;  %v1670_v5 = vor.u32 %v1792_v4, %v1669_v3  ;;  %v1458_v47 = vor.u32 %v1737_v35, %v1455_v36  ;;  %s1273_s28 = scalar_lea.hbm %s2423_s5, %s1804_s16  ;;  %s1274_s13 = sshll.u32 %s2336_s12, 4  ;;  %s1275_s13 = int_to_ptr.vmem [resolvable:$true] %s1274_s13 }
  0x6c   : > { %1037 = vmatpush.bf16.msrb.mxu0 %v1606_v2  ;;  %s1276_s10 = sshll.u32 %s1273_s28, 4  ;;  %s1261_s22 = scalar_lea.sflag [#allocation4], %s2237_s17  ;;  %s1277_s10 = int_to_ptr.hbm [resolvable:$true] %s1276_s10 }
  0x6d   : > { %1086 = vmatpush.bf16.msrb.mxu1 %v1670_v5  ;;  %s2020_s14 = sshra.s32 %s1277_s10, 4  ;;  %s2026_s30 = scalar_lea.hbm %s2423_s5, 256  ;;  %s2021_s14 = int_to_ptr.hbm [resolvable:$true] %s2020_s14 }
  0x6e   : > { %1135 = vmatpush.bf16.msrb.mxu2 %v1610_v61  ;;  %s2022_s15 = scalar_lea.hbm %s2021_s14, 128  ;;  %p2027_p11 = scmp.lt.s32.totalorder %s2021_s14, %s2423_s5 }
  0x6f   : > { %1184 = vmatpush.bf16.msrb.mxu3 %v1674_v1  ;;  %p2023_p1 = scmp.ne.s32.totalorder %s2021_s14, %s2022_s15  ;;  %p2028_p9 = scmp.lt.s32.totalorder %s2026_s30, %s2022_s15 }
  0x71   : > { %p2024_p4 = pnand %p2023_p1, %p2207_p3  ;;  %p2029_p2 = por %p2028_p9, %p2027_p11 }
  0x72   : > { %1136 = vmatpush.bf16.msrb.mxu2 %v1602_v15 }
  0x73   : > { %1185 = vmatpush.bf16.msrb.mxu3 %v1666_v19  ;;  %p2025_p8 = pneg %p2024_p4 }
  0x75   : > { %p2030_p10 = pnand %p2029_p2, %p2025_p8 }
  0x76   : > { %1137 = vmatpush.bf16.msrb.mxu2 %v1594_v32 }
  0x77   : > { %640 = vmatmul.bf16.gmra.mxu0 %v1414_v20 }
  0x78   : > { %689 = vmatmul.bf16.gmra.mxu1 %v1418_v21 }
  0x79   : > { %738 = vmatmul.bf16.gmra.mxu2 %v1414_v20  ;;  %v1598_v20 = vor.u32 %v1774_v18, %v1597_v17 }
  0x7a   : > { %787 = vmatmul.bf16.gmra.mxu3 %v1418_v21  ;;  %v1661_v21 = vld [vmem:[#allocation8 + $0x90] sm:$0xf] }
  0x7b   : > { %v1662_v23 = vor.u32 %v1790_v22, %v1661_v21  ;;  %1038 = vmatpush.bf16.msrb.mxu0 %v1598_v20 }
  0x7d   : > { %1087 = vmatpush.bf16.msrb.mxu1 %v1662_v23 }
  0x7f   : > { %1039 = vmatpush.bf16.msrb.mxu0 %v1590_v43 }
  0x81   : > { %1088 = vmatpush.bf16.msrb.mxu1 %v1654_v46 }
  0x87   : > { %645 = vmatmul.bf16.gmra.mxu0 %v1422_v38 }
  0x88   : > { %694 = vmatmul.bf16.gmra.mxu1 %v1426_v39 }
  0x89   : > { %743 = vmatmul.bf16.gmra.mxu2 %v1422_v38  ;;  %v1655_v38 = vld [vmem:[#allocation8 + $0x88] sm:$0xf0] }
  0x8a   : > { %792 = vmatmul.bf16.gmra.mxu3 %v1426_v39  ;;  %v1658_v39 = vor.u32 %v1787_v37, %v1655_v38 }
  0x8c   : > { %1186 = vmatpush.bf16.msrb.mxu3 %v1658_v39 }
  0x97   : > { %650 = vmatmul.bf16.gmra.mxu0 %v1430_v56 }
  0x98   : > { %699 = vmatmul.bf16.gmra.mxu1 %v1434_v57 }
  0x99   : > { %748 = vmatmul.bf16.gmra.mxu2 %v1430_v56 }
  0x9a   : > { %797 = vmatmul.bf16.gmra.mxu3 %v1434_v57 }
  0xa7   : > { %655 = vmatmul.bf16.gmra.mxu0 %v1438_v10 }
  0xa8   : > { %704 = vmatmul.bf16.gmra.mxu1 %v1442_v11 }
  0xa9   : > { %753 = vmatmul.bf16.gmra.mxu2 %v1438_v10 }
  0xaa   : > { %802 = vmatmul.bf16.gmra.mxu3 %v1442_v11 }
  0xb7   : > { %660 = vmatmul.bf16.gmra.mxu0 %v1446_v28 }
  0xb8   : > { %709 = vmatmul.bf16.gmra.mxu1 %v1450_v29 }
  0xb9   : > { %758 = vmatmul.bf16.gmra.mxu2 %v1446_v28 }
  0xba   : > { %807 = vmatmul.bf16.gmra.mxu3 %v1450_v29 }
  0xc7   : > { %665 = vmatmul.bf16.gmra.mxu0 %v1454_v45 }
  0xc8   : > { %714 = vmatmul.bf16.gmra.mxu1 %v1458_v47 }
  0xc9   : > { %763 = vmatmul.bf16.gmra.mxu2 %v1454_v45 }
  0xca   : > { %812 = vmatmul.bf16.gmra.mxu3 %v1458_v47 }
  0xd4   : > { %v631_v49 = vpop.f32.mrf.mxu0 }
  0xd5   : > { %v680_v51 = vpop.f32.mrf.mxu1  ;;  %v632_v52 = vadd.f32 %v631_v49, %v2289_v50 }
  0xd7   : > { %v681_v57 = vadd.f32 %v680_v51, %v632_v52 }
  0xd9   : > { %v818_v62 = vmax.f32 %v681_v57, 0.0 }
  0xdc   : > { %v729_v53 = vpop.f32.mrf.mxu2  ;;  %v633_v56 = vpop.f32.mrf.mxu0 }
  0xdd   : > { %v778_v55 = vpop.f32.mrf.mxu3  ;;  %v634_v58 = vadd.f32 %v633_v56, %v2289_v50  ;;  %v682_v59 = vpop.f32.mrf.mxu1  ;;  %v730_v61 = vadd.f32 %v729_v53, %v2292_v54 }
  0xdf   : > { %v683_v60 = vadd.f32 %v682_v59, %v634_v58  ;;  %v779_v2 = vadd.f32 %v778_v55, %v730_v61 }
  0xe1   : > { %v820_v63 = vmax.f32 %v683_v60, 0.0  ;;  %v819_v8 = vmax.f32 %v779_v2, 0.0 }
  0xe3   : > { %v850_v1 = vpack.c.bf16 %v820_v63, %v818_v62 }
  0xe4   : > { %v731_v0 = vpop.f32.mrf.mxu2  ;;  %v636_v5 = vpop.f32.mrf.mxu0 }
  0xe5   : > { %v732_v3 = vadd.f32 %v731_v0, %v2292_v54  ;;  %v780_v4 = vpop.f32.mrf.mxu3  ;;  %v685_v6 = vpop.f32.mrf.mxu1  ;;  %1040 = vmatmul.bf16.vlgmr.msrb.gmra.mxu0 %v850_v1  ;;  %1138 = vmatmul.bf16.vlgmr.msrb.gmra.mxu2 %v850_v1  ;;  %v637_v10 = vadd.f32 %v636_v5, %v2289_v50 }
  0xe7   : > { %v781_v7 = vadd.f32 %v780_v4, %v732_v3  ;;  %v686_v15 = vadd.f32 %v685_v6, %v637_v10 }
  0xe9   : > { %v821_v9 = vmax.f32 %v781_v7, 0.0  ;;  %v822_v20 = vmax.f32 %v686_v15, 0.0 }
  0xeb   : > { %v851_v11 = vpack.c.bf16 %v821_v9, %v819_v8 }
  0xec   : > { %v734_v12 = vpop.f32.mrf.mxu2  ;;  %v638_v14 = vpop.f32.mrf.mxu0 }
  0xed   : > { %v783_v13 = vpop.f32.mrf.mxu3  ;;  %1089 = vmatmul.bf16.vlgmr.msrb.gmra.mxu1 %v851_v11  ;;  %1187 = vmatmul.bf16.vlgmr.msrb.gmra.mxu3 %v851_v11  ;;  %v639_v16 = vadd.f32 %v638_v14, %v2289_v50  ;;  %v687_v17 = vpop.f32.mrf.mxu1  ;;  %v735_v19 = vadd.f32 %v734_v12, %v2292_v54 }
  0xef   : > { %v688_v18 = vadd.f32 %v687_v17, %v639_v16  ;;  %v784_v24 = vadd.f32 %v783_v13, %v735_v19 }
  0xf1   : > { %v824_v21 = vmax.f32 %v688_v18, 0.0  ;;  %v823_v30 = vmax.f32 %v784_v24, 0.0 }
  0xf3   : > { %v852_v23 = vpack.c.bf16 %v824_v21, %v822_v20 }
  0xf4   : > { %v736_v22 = vpop.f32.mrf.mxu2  ;;  %v641_v27 = vpop.f32.mrf.mxu0 }
  0xf5   : > { %v737_v25 = vadd.f32 %v736_v22, %v2292_v54  ;;  %v785_v26 = vpop.f32.mrf.mxu3  ;;  %v690_v28 = vpop.f32.mrf.mxu1  ;;  %1045 = vmatmul.bf16.gmra.mxu0 %v852_v23  ;;  %1143 = vmatmul.bf16.gmra.mxu2 %v852_v23  ;;  %v642_v32 = vadd.f32 %v641_v27, %v2289_v50 }
  0xf7   : > { %v786_v29 = vadd.f32 %v785_v26, %v737_v25  ;;  %v691_v37 = vadd.f32 %v690_v28, %v642_v32 }
  0xf9   : > { %v825_v31 = vmax.f32 %v786_v29, 0.0  ;;  %v826_v42 = vmax.f32 %v691_v37, 0.0 }
  0xfb   : > { %v853_v33 = vpack.c.bf16 %v825_v31, %v823_v30 }
  0xfc   : > { %v739_v34 = vpop.f32.mrf.mxu2  ;;  %v643_v36 = vpop.f32.mrf.mxu0 }
  0xfd   : > { %v788_v35 = vpop.f32.mrf.mxu3  ;;  %1094 = vmatmul.bf16.gmra.mxu1 %v853_v33  ;;  %1192 = vmatmul.bf16.gmra.mxu3 %v853_v33  ;;  %v644_v38 = vadd.f32 %v643_v36, %v2289_v50  ;;  %v692_v39 = vpop.f32.mrf.mxu1  ;;  %v740_v41 = vadd.f32 %v739_v34, %v2292_v54 }
  0xff   : > { %v693_v40 = vadd.f32 %v692_v39, %v644_v38  ;;  %v789_v46 = vadd.f32 %v788_v35, %v740_v41 }
 0x101   : > { %v828_v43 = vmax.f32 %v693_v40, 0.0  ;;  %v827_v53 = vmax.f32 %v789_v46, 0.0 }
 0x103   : > { %v854_v45 = vpack.c.bf16 %v828_v43, %v826_v42 }
 0x104   : > { %v741_v44 = vpop.f32.mrf.mxu2  ;;  %v646_v49 = vpop.f32.mrf.mxu0 }
 0x105   : > { %v742_v47 = vadd.f32 %v741_v44, %v2292_v54  ;;  %v790_v48 = vpop.f32.mrf.mxu3  ;;  %v695_v51 = vpop.f32.mrf.mxu1  ;;  %1050 = vmatmul.bf16.gmra.mxu0 %v854_v45  ;;  %1148 = vmatmul.bf16.gmra.mxu2 %v854_v45  ;;  %v647_v56 = vadd.f32 %v646_v49, %v2289_v50 }
 0x107   : > { %v791_v52 = vadd.f32 %v790_v48, %v742_v47  ;;  %v696_v61 = vadd.f32 %v695_v51, %v647_v56 }
 0x109   : > { %v829_v55 = vmax.f32 %v791_v52, 0.0  ;;  %v830_v2 = vmax.f32 %v696_v61, 0.0 }
 0x10b   : > { %v855_v57 = vpack.c.bf16 %v829_v55, %v827_v53 }
 0x10c   : > { %v744_v58 = vpop.f32.mrf.mxu2  ;;  %v648_v60 = vpop.f32.mrf.mxu0 }
 0x10d   : > { %v793_v59 = vpop.f32.mrf.mxu3  ;;  %1099 = vmatmul.bf16.gmra.mxu1 %v855_v57  ;;  %1197 = vmatmul.bf16.gmra.mxu3 %v855_v57  ;;  %v649_v62 = vadd.f32 %v648_v60, %v2289_v50  ;;  %v697_v63 = vpop.f32.mrf.mxu1  ;;  %v745_v1 = vadd.f32 %v744_v58, %v2292_v54 }
 0x10f   : > { %v698_v0 = vadd.f32 %v697_v63, %v649_v62  ;;  %v794_v6 = vadd.f32 %v793_v59, %v745_v1 }
 0x111   : > { %v832_v3 = vmax.f32 %v698_v0, 0.0  ;;  %v831_v12 = vmax.f32 %v794_v6, 0.0 }
 0x113   : > { %v856_v5 = vpack.c.bf16 %v832_v3, %v830_v2 }
 0x114   : > { %v746_v4 = vpop.f32.mrf.mxu2  ;;  %v651_v9 = vpop.f32.mrf.mxu0 }
 0x115   : > { %v747_v7 = vadd.f32 %v746_v4, %v2292_v54  ;;  %v795_v8 = vpop.f32.mrf.mxu3  ;;  %v700_v10 = vpop.f32.mrf.mxu1  ;;  %1055 = vmatmul.bf16.gmra.mxu0 %v856_v5  ;;  %1153 = vmatmul.bf16.gmra.mxu2 %v856_v5  ;;  %v652_v14 = vadd.f32 %v651_v9, %v2289_v50 }
 0x117   : > { %v796_v11 = vadd.f32 %v795_v8, %v747_v7  ;;  %v701_v19 = vadd.f32 %v700_v10, %v652_v14 }
 0x119   : > { %v833_v13 = vmax.f32 %v796_v11, 0.0  ;;  %v834_v24 = vmax.f32 %v701_v19, 0.0 }
 0x11b   : > { %v857_v15 = vpack.c.bf16 %v833_v13, %v831_v12 }
 0x11c   : > { %v749_v16 = vpop.f32.mrf.mxu2  ;;  %v653_v18 = vpop.f32.mrf.mxu0 }
 0x11d   : > { %v798_v17 = vpop.f32.mrf.mxu3  ;;  %1104 = vmatmul.bf16.gmra.mxu1 %v857_v15  ;;  %1202 = vmatmul.bf16.gmra.mxu3 %v857_v15  ;;  %v654_v20 = vadd.f32 %v653_v18, %v2289_v50  ;;  %v702_v21 = vpop.f32.mrf.mxu1  ;;  %v750_v23 = vadd.f32 %v749_v16, %v2292_v54 }
 0x11f   : > { %v703_v22 = vadd.f32 %v702_v21, %v654_v20  ;;  %v799_v28 = vadd.f32 %v798_v17, %v750_v23 }
 0x121   : > { %v836_v25 = vmax.f32 %v703_v22, 0.0  ;;  %v835_v34 = vmax.f32 %v799_v28, 0.0 }
 0x123   : > { %v858_v26 = vpack.c.bf16 %v836_v25, %v834_v24 }
 0x124   : > { %v751_v27 = vpop.f32.mrf.mxu2  ;;  %v656_v31 = vpop.f32.mrf.mxu0 }
 0x125   : > { %v752_v29 = vadd.f32 %v751_v27, %v2292_v54  ;;  %v800_v30 = vpop.f32.mrf.mxu3  ;;  %v705_v32 = vpop.f32.mrf.mxu1  ;;  %1060 = vmatmul.bf16.gmra.mxu0 %v858_v26  ;;  %1158 = vmatmul.bf16.gmra.mxu2 %v858_v26  ;;  %v657_v36 = vadd.f32 %v656_v31, %v2289_v50 }
 0x127   : > { %v801_v33 = vadd.f32 %v800_v30, %v752_v29  ;;  %v706_v41 = vadd.f32 %v705_v32, %v657_v36 }
 0x129   : > { %v837_v35 = vmax.f32 %v801_v33, 0.0  ;;  %v838_v46 = vmax.f32 %v706_v41, 0.0 }
 0x12b   : > { %v859_v37 = vpack.c.bf16 %v837_v35, %v835_v34 }
 0x12c   : > { %v754_v38 = vpop.f32.mrf.mxu2  ;;  %v658_v40 = vpop.f32.mrf.mxu0 }
 0x12d   : > { %v803_v39 = vpop.f32.mrf.mxu3  ;;  %1109 = vmatmul.bf16.gmra.mxu1 %v859_v37  ;;  %1207 = vmatmul.bf16.gmra.mxu3 %v859_v37  ;;  %v659_v42 = vadd.f32 %v658_v40, %v2289_v50  ;;  %v707_v43 = vpop.f32.mrf.mxu1  ;;  %v755_v45 = vadd.f32 %v754_v38, %v2292_v54 }
 0x12f   : > { %v708_v44 = vadd.f32 %v707_v43, %v659_v42  ;;  %v804_v51 = vadd.f32 %v803_v39, %v755_v45  ;;  %v866_v39 = vld [vmem:[%s2422_s4] sm:$0x3] }
 0x130   : > { %v2328_v42 = vperm.slane %v866_v39, 0 }
 0x131   : > { %v840_v47 = vmax.f32 %v708_v44, 0.0  ;;  %v839_v58 = vmax.f32 %v804_v51, 0.0 }
 0x133   : > { %v860_v48 = vpack.c.bf16 %v840_v47, %v838_v46 }
 0x134   : > { %v756_v49 = vpop.f32.mrf.mxu2  ;;  %v661_v55 = vpop.f32.mrf.mxu0 }
 0x135   : > { %v757_v52 = vadd.f32 %v756_v49, %v2292_v54  ;;  %v805_v53 = vpop.f32.mrf.mxu3  ;;  %v710_v56 = vpop.f32.mrf.mxu1  ;;  %1065 = vmatmul.bf16.gmra.mxu0 %v860_v48  ;;  %1163 = vmatmul.bf16.gmra.mxu2 %v860_v48  ;;  %v662_v60 = vadd.f32 %v661_v55, %v2289_v50 }
 0x137   : > { %v806_v57 = vadd.f32 %v805_v53, %v757_v52  ;;  %v711_v1 = vadd.f32 %v710_v56, %v662_v60 }
 0x139   : > { %v841_v59 = vmax.f32 %v806_v57, 0.0  ;;  %v842_v6 = vmax.f32 %v711_v1, 0.0 }
 0x13b   : > { %v861_v61 = vpack.c.bf16 %v841_v59, %v839_v58 }
 0x13c   : > { %v759_v62 = vpop.f32.mrf.mxu2  ;;  %v663_v0 = vpop.f32.mrf.mxu0 }
 0x13d   : > { %v808_v63 = vpop.f32.mrf.mxu3  ;;  %1114 = vmatmul.bf16.gmra.mxu1 %v861_v61  ;;  %1212 = vmatmul.bf16.gmra.mxu3 %v861_v61  ;;  %v664_v2 = vadd.f32 %v663_v0, %v2289_v50  ;;  %v712_v3 = vpop.f32.mrf.mxu1  ;;  %v760_v5 = vadd.f32 %v759_v62, %v2292_v54 }
 0x13f   : > { %v713_v4 = vadd.f32 %v712_v3, %v664_v2  ;;  %v809_v10 = vadd.f32 %v808_v63, %v760_v5 }
 0x141   : > { %v844_v7 = vmax.f32 %v713_v4, 0.0  ;;  %v843_v16 = vmax.f32 %v809_v10, 0.0 }
 0x143   : > { %v862_v8 = vpack.c.bf16 %v844_v7, %v842_v6 }
 0x144   : > { %v761_v9 = vpop.f32.mrf.mxu2  ;;  %v666_v13 = vpop.f32.mrf.mxu0 }
 0x145   : > { %v762_v11 = vadd.f32 %v761_v9, %v2292_v54  ;;  %v810_v12 = vpop.f32.mrf.mxu3  ;;  %v715_v14 = vpop.f32.mrf.mxu1  ;;  %1070 = vmatmul.bf16.gmra.mxu0 %v862_v8  ;;  %1168 = vmatmul.bf16.gmra.mxu2 %v862_v8  ;;  %v667_v18 = vadd.f32 %v666_v13, %v2289_v50 }
 0x147   : > { %v811_v15 = vadd.f32 %v810_v12, %v762_v11  ;;  %v716_v23 = vadd.f32 %v715_v14, %v667_v18 }
 0x149   : > { %v845_v17 = vmax.f32 %v811_v15, 0.0  ;;  %v846_v28 = vmax.f32 %v716_v23, 0.0 }
 0x14b   : > { %v863_v19 = vpack.c.bf16 %v845_v17, %v843_v16 }
 0x14c   : > { %v764_v20 = vpop.f32.mrf.mxu2  ;;  %v668_v22 = vpop.f32.mrf.mxu0 }
 0x14d   : > { %v813_v21 = vpop.f32.mrf.mxu3  ;;  %1119 = vmatmul.bf16.gmra.mxu1 %v863_v19  ;;  %1217 = vmatmul.bf16.gmra.mxu3 %v863_v19  ;;  %v669_v24 = vadd.f32 %v668_v22, %v2289_v50  ;;  %v717_v25 = vpop.f32.mrf.mxu1  ;;  %v765_v27 = vadd.f32 %v764_v20, %v2292_v54 }
 0x14f   : > { %v718_v26 = vadd.f32 %v717_v25, %v669_v24  ;;  %v814_v32 = vadd.f32 %v813_v21, %v765_v27 }
 0x151   : > { %v848_v29 = vmax.f32 %v718_v26, 0.0  ;;  %v847_v36 = vmax.f32 %v814_v32, 0.0 }
 0x153   : > { %v864_v30 = vpack.c.bf16 %v848_v29, %v846_v28 }
 0x154   : > { %v766_v31 = vpop.f32.mrf.mxu2 }
 0x155   : > { %v767_v33 = vadd.f32 %v766_v31, %v2292_v54  ;;  %v815_v34 = vpop.f32.mrf.mxu3  ;;  %1075 = vmatmul.bf16.gmra.mxu0 %v864_v30  ;;  %1173 = vmatmul.bf16.gmra.mxu2 %v864_v30  ;;  %v2330_v54 = vperm.slane %v866_v39, 1 }
 0x157   : > { %v816_v35 = vadd.f32 %v815_v34, %v767_v33 }
 0x159   : > { %v849_v37 = vmax.f32 %v816_v35, 0.0 }
 0x15b   : > { %v865_v38 = vpack.c.bf16 %v849_v37, %v847_v36 }
 0x15d   : > { %1124 = vmatmul.bf16.gmra.mxu1 %v865_v38  ;;  %1222 = vmatmul.bf16.gmra.mxu3 %v865_v38 }
 0x162   : > { %v1041_v50 = vpop.f32.mrf.mxu0 }
 0x163   : > { %v1042_v44 = vadd.f32 %v1041_v50, %v2328_v42 }
 0x168   : > { %v1139_v40 = vpop.f32.mrf.mxu2 }
 0x169   : > { %v1140_v45 = vadd.f32 %v1139_v40, %v2330_v54 }
 0x16a   : > { %v1090_v41 = vpop.f32.mrf.mxu1  ;;  %v1043_v43 = vpop.f32.mrf.mxu0 }
 0x16b   : > { %v1091_v47 = vadd.f32 %v1090_v41, %v1042_v44  ;;  %v1044_v55 = vadd.f32 %v1043_v43, %v2328_v42 }
 0x170   : > { %v1188_v46 = vpop.f32.mrf.mxu3  ;;  %v1141_v49 = vpop.f32.mrf.mxu2 }
 0x171   : > { %v1189_v48 = vadd.f32 %v1188_v46, %v1140_v45  ;;  %v1142_v56 = vadd.f32 %v1141_v49, %v2330_v54 }
 0x172   : > { %v1092_v51 = vpop.f32.mrf.mxu1  ;;  %v1046_v53 = vpop.f32.mrf.mxu0 }
 0x173   : > { %v1228_v52 = vpack.c.bf16 %v1189_v48, %v1091_v47  ;;  %v1093_v58 = vadd.f32 %v1092_v51, %v1044_v55  ;;  %v1047_v0 = vadd.f32 %v1046_v53, %v2328_v42 }
 0x175   : > { %1244 = vst [vmem:[%s2336_s12] sm:$0xff] %v1228_v52 }
 0x178   : > { %v1190_v57 = vpop.f32.mrf.mxu3  ;;  %v1144_v60 = vpop.f32.mrf.mxu2 }
 0x179   : > { %v1191_v59 = vadd.f32 %v1190_v57, %v1142_v56  ;;  %v1145_v1 = vadd.f32 %v1144_v60, %v2330_v54 }
 0x17a   : > { %v1095_v61 = vpop.f32.mrf.mxu1  ;;  %v1048_v63 = vpop.f32.mrf.mxu0 }
 0x17b   : > { %v1229_v62 = vpack.c.bf16 %v1191_v59, %v1093_v58  ;;  %v1096_v3 = vadd.f32 %v1095_v61, %v1047_v0  ;;  %v1049_v9 = vadd.f32 %v1048_v63, %v2328_v42 }
 0x17d   : > { %1245 = vst [vmem:[%s2336_s12 + $0x8] sm:$0xff] %v1229_v62 }
 0x180   : > { %v1193_v2 = vpop.f32.mrf.mxu3  ;;  %v1146_v5 = vpop.f32.mrf.mxu2 }
 0x181   : > { %v1194_v4 = vadd.f32 %v1193_v2, %v1145_v1  ;;  %v1147_v10 = vadd.f32 %v1146_v5, %v2330_v54 }
 0x182   : > { %v1097_v6 = vpop.f32.mrf.mxu1  ;;  %v1051_v8 = vpop.f32.mrf.mxu0 }
 0x183   : > { %v1230_v7 = vpack.c.bf16 %v1194_v4, %v1096_v3  ;;  %v1098_v12 = vadd.f32 %v1097_v6, %v1049_v9  ;;  %v1052_v18 = vadd.f32 %v1051_v8, %v2328_v42 }
 0x185   : > { %1246 = vst [vmem:[%s2336_s12 + $0x10] sm:$0xff] %v1230_v7 }
 0x188   : > { %v1195_v11 = vpop.f32.mrf.mxu3  ;;  %v1149_v14 = vpop.f32.mrf.mxu2 }
 0x189   : > { %v1196_v13 = vadd.f32 %v1195_v11, %v1147_v10  ;;  %v1150_v19 = vadd.f32 %v1149_v14, %v2330_v54 }
 0x18a   : > { %v1100_v15 = vpop.f32.mrf.mxu1  ;;  %v1053_v17 = vpop.f32.mrf.mxu0 }
 0x18b   : > { %v1231_v16 = vpack.c.bf16 %v1196_v13, %v1098_v12  ;;  %v1101_v21 = vadd.f32 %v1100_v15, %v1052_v18  ;;  %v1054_v27 = vadd.f32 %v1053_v17, %v2328_v42 }
 0x18d   : > { %1247 = vst [vmem:[%s2336_s12 + $0x18] sm:$0xff] %v1231_v16 }
 0x190   : > { %v1198_v20 = vpop.f32.mrf.mxu3  ;;  %v1151_v23 = vpop.f32.mrf.mxu2 }
 0x191   : > { %v1199_v22 = vadd.f32 %v1198_v20, %v1150_v19  ;;  %v1152_v28 = vadd.f32 %v1151_v23, %v2330_v54 }
 0x192   : > { %v1102_v24 = vpop.f32.mrf.mxu1  ;;  %v1056_v26 = vpop.f32.mrf.mxu0 }
 0x193   : > { %v1232_v25 = vpack.c.bf16 %v1199_v22, %v1101_v21  ;;  %v1103_v30 = vadd.f32 %v1102_v24, %v1054_v27  ;;  %v1057_v36 = vadd.f32 %v1056_v26, %v2328_v42 }
 0x195   : > { %1248 = vst [vmem:[%s2336_s12 + $0x20] sm:$0xff] %v1232_v25 }
 0x198   : > { %v1200_v29 = vpop.f32.mrf.mxu3  ;;  %v1154_v32 = vpop.f32.mrf.mxu2 }
 0x199   : > { %v1201_v31 = vadd.f32 %v1200_v29, %v1152_v28  ;;  %v1155_v37 = vadd.f32 %v1154_v32, %v2330_v54 }
 0x19a   : > { %v1105_v33 = vpop.f32.mrf.mxu1  ;;  %v1058_v35 = vpop.f32.mrf.mxu0 }
 0x19b   : > { %v1233_v34 = vpack.c.bf16 %v1201_v31, %v1103_v30  ;;  %v1106_v50 = vadd.f32 %v1105_v33, %v1057_v36  ;;  %v1059_v45 = vadd.f32 %v1058_v35, %v2328_v42 }
 0x19d   : > { %1249 = vst [vmem:[%s2336_s12 + $0x28] sm:$0xff] %v1233_v34 }
 0x1a0   : > { %v1203_v38 = vpop.f32.mrf.mxu3  ;;  %v1156_v40 = vpop.f32.mrf.mxu2 }
 0x1a1   : > { %v1204_v39 = vadd.f32 %v1203_v38, %v1155_v37  ;;  %v1157_v46 = vadd.f32 %v1156_v40, %v2330_v54 }
 0x1a2   : > { %v1107_v41 = vpop.f32.mrf.mxu1  ;;  %v1061_v44 = vpop.f32.mrf.mxu0 }
 0x1a3   : > { %v1234_v43 = vpack.c.bf16 %v1204_v39, %v1106_v50  ;;  %v1108_v48 = vadd.f32 %v1107_v41, %v1059_v45  ;;  %v1062_v56 = vadd.f32 %v1061_v44, %v2328_v42 }
 0x1a5   : > { %1250 = vst [vmem:[%s2336_s12 + $0x30] sm:$0xff] %v1234_v43 }
 0x1a8   : > { %v1205_v47 = vpop.f32.mrf.mxu3  ;;  %v1159_v51 = vpop.f32.mrf.mxu2 }
 0x1a9   : > { %v1206_v49 = vadd.f32 %v1205_v47, %v1157_v46  ;;  %v1160_v57 = vadd.f32 %v1159_v51, %v2330_v54 }
 0x1aa   : > { %v1110_v52 = vpop.f32.mrf.mxu1  ;;  %v1063_v55 = vpop.f32.mrf.mxu0 }
 0x1ab   : > { %v1235_v53 = vpack.c.bf16 %v1206_v49, %v1108_v48  ;;  %v1111_v59 = vadd.f32 %v1110_v52, %v1062_v56  ;;  %v1064_v1 = vadd.f32 %v1063_v55, %v2328_v42 }
 0x1ad   : > { %1251 = vst [vmem:[%s2336_s12 + $0x38] sm:$0xff] %v1235_v53 }
 0x1b0   : > { %v1208_v58 = vpop.f32.mrf.mxu3  ;;  %v1161_v61 = vpop.f32.mrf.mxu2 }
 0x1b1   : > { %v1209_v60 = vadd.f32 %v1208_v58, %v1160_v57  ;;  %v1162_v2 = vadd.f32 %v1161_v61, %v2330_v54 }
 0x1b2   : > { %v1112_v62 = vpop.f32.mrf.mxu1  ;;  %v1066_v0 = vpop.f32.mrf.mxu0 }
 0x1b3   : > { %v1236_v63 = vpack.c.bf16 %v1209_v60, %v1111_v59  ;;  %v1113_v4 = vadd.f32 %v1112_v62, %v1064_v1  ;;  %v1067_v10 = vadd.f32 %v1066_v0, %v2328_v42 }
 0x1b5   : > { %1252 = vst [vmem:[%s2336_s12 + $0x40] sm:$0xff] %v1236_v63 }
 0x1b8   : > { %v1210_v3 = vpop.f32.mrf.mxu3  ;;  %v1164_v6 = vpop.f32.mrf.mxu2 }
 0x1b9   : > { %v1211_v5 = vadd.f32 %v1210_v3, %v1162_v2  ;;  %v1165_v11 = vadd.f32 %v1164_v6, %v2330_v54 }
 0x1ba   : > { %v1115_v7 = vpop.f32.mrf.mxu1  ;;  %v1068_v9 = vpop.f32.mrf.mxu0 }
 0x1bb   : > { %v1237_v8 = vpack.c.bf16 %v1211_v5, %v1113_v4  ;;  %v1116_v13 = vadd.f32 %v1115_v7, %v1067_v10  ;;  %v1069_v19 = vadd.f32 %v1068_v9, %v2328_v42 }
 0x1bd   : > { %1253 = vst [vmem:[%s2336_s12 + $0x48] sm:$0xff] %v1237_v8 }
 0x1c0   : > { %v1213_v12 = vpop.f32.mrf.mxu3  ;;  %v1166_v15 = vpop.f32.mrf.mxu2 }
 0x1c1   : > { %v1214_v14 = vadd.f32 %v1213_v12, %v1165_v11  ;;  %v1167_v20 = vadd.f32 %v1166_v15, %v2330_v54 }
 0x1c2   : > { %v1117_v16 = vpop.f32.mrf.mxu1  ;;  %v1071_v18 = vpop.f32.mrf.mxu0 }
 0x1c3   : > { %v1238_v17 = vpack.c.bf16 %v1214_v14, %v1116_v13  ;;  %v1118_v22 = vadd.f32 %v1117_v16, %v1069_v19  ;;  %v1072_v27 = vadd.f32 %v1071_v18, %v2328_v42 }
 0x1c5   : > { %1254 = vst [vmem:[%s2336_s12 + $0x50] sm:$0xff] %v1238_v17 }
 0x1c8   : > { %v1215_v21 = vpop.f32.mrf.mxu3  ;;  %v1169_v24 = vpop.f32.mrf.mxu2 }
 0x1c9   : > { %v1216_v23 = vadd.f32 %v1215_v21, %v1167_v20  ;;  %v1170_v28 = vadd.f32 %v1169_v24, %v2330_v54 }
 0x1ca   : > { %v1120_v25 = vpop.f32.mrf.mxu1  ;;  %v1073_v29 = vpop.f32.mrf.mxu0 }
 0x1cb   : > { %v1239_v26 = vpack.c.bf16 %v1216_v23, %v1118_v22  ;;  %v1121_v31 = vadd.f32 %v1120_v25, %v1072_v27  ;;  %v1074_v36 = vadd.f32 %v1073_v29, %v2328_v42 }
 0x1cd   : > { %1255 = vst [vmem:[%s2336_s12 + $0x58] sm:$0xff] %v1239_v26 }
 0x1d0   : > { %v1218_v30 = vpop.f32.mrf.mxu3  ;;  %v1171_v33 = vpop.f32.mrf.mxu2 }
 0x1d1   : > { %v1219_v32 = vadd.f32 %v1218_v30, %v1170_v28  ;;  %v1172_v37 = vadd.f32 %v1171_v33, %v2330_v54 }
 0x1d2   : > { %v1122_v34 = vpop.f32.mrf.mxu1  ;;  %v1076_v40 = vpop.f32.mrf.mxu0 }
 0x1d3   : > { %v1240_v35 = vpack.c.bf16 %v1219_v32, %v1121_v31  ;;  %v1123_v50 = vadd.f32 %v1122_v34, %v1074_v36  ;;  %v1077_v45 = vadd.f32 %v1076_v40, %v2328_v42 }
 0x1d5   : > { %1256 = vst [vmem:[%s2336_s12 + $0x60] sm:$0xff] %v1240_v35 }
 0x1d8   : > { %v1220_v38 = vpop.f32.mrf.mxu3  ;;  %v1174_v41 = vpop.f32.mrf.mxu2 }
 0x1d9   : > { %v1221_v39 = vadd.f32 %v1220_v38, %v1172_v37  ;;  %v1175_v46 = vadd.f32 %v1174_v41, %v2330_v54 }
 0x1da   : > { %v1125_v44 = vpop.f32.mrf.mxu1  ;;  %v1078_v52 = vpop.f32.mrf.mxu0 }
 0x1db   : > { %v1241_v43 = vpack.c.bf16 %v1221_v39, %v1123_v50  ;;  %v1126_v48 = vadd.f32 %v1125_v44, %v1077_v45  ;;  %v1079_v56 = vadd.f32 %v1078_v52, %v2328_v42 }
 0x1dd   : > { %1257 = vst [vmem:[%s2336_s12 + $0x68] sm:$0xff] %v1241_v43 }
 0x1e0   : > { %v1223_v47 = vpop.f32.mrf.mxu3  ;;  %v1176_v53 = vpop.f32.mrf.mxu2 }
 0x1e1   : > { %v1224_v49 = vadd.f32 %v1223_v47, %v1175_v46  ;;  %v1177_v57 = vadd.f32 %v1176_v53, %v2330_v54 }
 0x1e2   : > { %v1127_v55 = vpop.f32.mrf.mxu1 }
 0x1e3   : > { %v1242_v51 = vpack.c.bf16 %v1224_v49, %v1126_v48  ;;  %v1128_v59 = vadd.f32 %v1127_v55, %v1079_v56 }
 0x1e5   : > { %1258 = vst [vmem:[%s2336_s12 + $0x70] sm:$0xff] %v1242_v51 }
 0x1e8   : > { %v1225_v58 = vpop.f32.mrf.mxu3 }
 0x1e9   : > { %v1226_v60 = vadd.f32 %v1225_v58, %v1177_v57 }
 0x1eb   : > { %v1243_v61 = vpack.c.bf16 %v1226_v60, %v1128_v59 }
 0x1ed   : > { %1259 = vst [vmem:[%s2336_s12 + $0x78] sm:$0xff] %v1243_v61 }
 0x1ee   : > { %2033 = shalt.err (!%p2030_p10)
}
 0x1ef   : > { %s2087_s17 = smov 128   ;;  %s2088_s29 = smov 8  }
 0x1f0   : > { %1819 = dma.vmem_to_hbm [thread:$0]  (%p2207_p3), %s1275_s13, 2048, %s1277_s10, %s1261_s22, %s2087_s17, %s2087_s17, %s2088_s29  }
 0x1f1 PF: > { %s1291_s12 = sand.u32 1, %s2068_s18   ;;  %p2432_p12 = scmp.ge.s32.totalorder %s2080_s21, 2 }
 0x1f2   : > { %s1292_s16 = scalar_lea.sflag [#allocation4], %s1291_s12 }
 0x1f3   : > { %p1836_p13 = pnand %p2432_p12, %p2154_p6 }
 0x1f5   : > { %p1837_p0 = pneg %p1836_p13 }
 0x1f7   : > { %2063 = dma.done.wait (%p1837_p0), %s1292_s16, 2048  }
 0x1f8   : > { %2065 = vsyncadd (%p1837_p0), %s1292_s16, 4294965248  ;;  %p20_p5 = scmp.ge.s32.totalorder %s2189_s27, 4   ;;  %s2433_s18 = smov %s2072_s19 }
 0x1f9   : > { %s2434_s19 = smov %s2076_s20  ;;  %s2435_s20 = smov %s2203_s6 }
 0x1fa   : > { %s2436_s21 = smov %s2189_s27  ;;  %22 = sbr.rel (!%p20_p5) target bundleno = 7 (0x7), region = 97 }
 0x1ff   :  { %1298 = vsyncpa [#allocation3], 1 }
 0x200   :  { %1300 = vsyncpa [#allocation3 + $0x1], 1 }
 0x201   :  { %1301 = vsyncpa [#allocation6], 1 }
 0x202   :  { %1302 = vsyncpa [#allocation9], 1 }
 0x203   :  { %1303 = vsyncpa [#allocation4], 1 }
 0x204   :  { %1305 = vsyncpa [#allocation4 + $0x1], 1 }

</bundles_post_ra>
